<compile_context>
chip_gen: v7x
topology: tpu7x:2x2x1
jax: 0.10.0
libtpu: 0.0.40
codegen_flags: <defaults>
</compile_context>

<pallas_src>
import jax
import jax.numpy as jnp
from jax.experimental import pallas as pl
from jax.experimental.pallas import tpu as pltpu


def _round_up(n: int, m: int) -> int:
    return ((n + m - 1) // m) * m


def _copy_kernel(x_ref, o_ref):
    # NullDDP adds no computation: copy the block verbatim.
    o_ref[...] = x_ref[...]


def _pick_row_tile(rows: int, lanes: int, itemsize: int) -> int:
    """Rows per grid step: ~4 MiB DMAs, >=2 grid steps for mid-size inputs."""
    target_bytes = 4 * 1024 * 1024
    tile = max(32, (target_bytes // (lanes * itemsize)) // 32 * 32)
    if rows > 64:
        # v7x megacore: prefer at least 2 grid steps so both TensorCores
        # share the copy (free for large inputs, ~2x for mid-size ones).
        tile = min(tile, _round_up(pl.cdiv(rows, 2), 32))
    if tile >= rows:
        return rows  # single full-extent block (exempt from (8,128) rule)
    return tile


@jax.jit
def pallas_identity(x: jax.Array) -> jax.Array:
    """Bit-exact identity via a tiled, lane-dense Pallas copy (opt-in demo).

    No padding, no trailing slice: reshapes are metadata-only under jit and
    ragged edge blocks are masked by Pallas itself.
    """
    orig_shape = x.shape
    total = x.size
    if total == 0:
        return x
    itemsize = jnp.dtype(x.dtype).itemsize

    lanes = None
    for cand in (512, 256, 128):
        if total % cand == 0:
            lanes = cand
            break

    if lanes is None:
        # Element count not a multiple of 128: tiny tensors go through a
        # single full-extent block; large ragged tensors use the zero-copy
        # delegation NullDDP actually performs.
        # TODO(synk): masked ragged-tail copy kernel for large non-128-multiple sizes.
        if total * itemsize > 8 * 1024 * 1024:
            return x
        x2d = x.reshape(1, total)
        out = pl.pallas_call(
            _copy_kernel,
            out_shape=jax.ShapeDtypeStruct(x2d.shape, x2d.dtype),
        )(x2d)
        return out.reshape(orig_shape)

    rows = total // lanes
    x2d = x.reshape(rows, lanes)
    row_tile = _pick_row_tile(rows, lanes, itemsize)
    grid = (pl.cdiv(rows, row_tile),)

    out2d = pl.pallas_call(
        _copy_kernel,
        out_shape=jax.ShapeDtypeStruct(x2d.shape, x2d.dtype),
        grid=grid,
        in_specs=[pl.BlockSpec((row_tile, lanes), lambda i: (i, 0))],
        out_specs=pl.BlockSpec((row_tile, lanes), lambda i: (i, 0)),
        compiler_params=pltpu.CompilerParams(
            dimension_semantics=("parallel",),
            # 2 in + 2 out double buffers of <=4 MiB tiles fit comfortably;
            # explicit raise needed on v5e (16 MiB scoped default), still
            # within v7x's 32 MiB default / 64 MiB physical.
            vmem_limit_bytes=32 * 1024 * 1024,
        ),
        cost_estimate=pl.CostEstimate(
            flops=0,
            transcendentals=0,
            bytes_accessed=2 * total * itemsize,
        ),
    )(x2d)

    return out2d.reshape(orig_shape)


def pallas_passthrough(x: jax.Array) -> jax.Array:
    """NullDDP's own data path: identity with zero copies and zero kernels."""
    return x


class NullDDP:
    """JAX mirror of the PyTorch NullDDP: DDP shim for non-distributed runs.

    forward(*args, **kwargs) delegates to the wrapped module unchanged --
    NullDDP itself adds zero compute and zero copies.
    """

    def __init__(self, module, *args, **kwargs):
        self.module = module
        self.require_backward_grad_sync = False

    def __call__(self, *args, **kwargs):
        return self.forward(*args, **kwargs)

    def forward(self, *args, **kwargs):
        return self.module(*args, **kwargs)


if __name__ == "__main__":
    key = jax.random.PRNGKey(0)
    # Small NCHW tensor consistent with a conv-style VAE input.
    x = jax.random.normal(key, (2, 4, 16, 16), dtype=jnp.float32)

    # 1) True NullDDP path: pure delegation -- no kernel, no copy.
    ddp_fast = NullDDP(pallas_passthrough)
    y_fast = ddp_fast(x)
    assert y_fast is x, "NullDDP fast path must return the wrapped output untouched"

    # 2) Opt-in Pallas identity kernel as the wrapped "module" (kernel demo).
    ddp_kernel = NullDDP(pallas_identity)
    y = jax.block_until_ready(ddp_kernel(x))

    assert y.shape == x.shape, (y.shape, x.shape)
    assert y.dtype == x.dtype, (y.dtype, x.dtype)
    assert bool(jnp.array_equal(y, x)), "NullDDP forward must be an exact pass-through"

    print("KERNEL_OK")
</pallas_src>

<mosaic_0001>
module attributes {stable_mosaic.version = 11 : i64} {
  func.func @_copy_kernel(%arg0: i32, %arg1: memref<4x512xf32, #tpu.memory_space<vmem>>, %arg2: memref<4x512xf32, #tpu.memory_space<vmem>>) attributes {dimension_semantics = [#tpu.dimension_semantics<parallel>], iteration_bounds = array<i64: 1>, scalar_prefetch = 0 : i64, scratch_operands = 0 : i64, tpu.core_type = #tpu.core_type<tc>, window_params = [{transform_indices = @transform_0, window_bounds = array<i64: 4, 512>}, {transform_indices = @transform_1, window_bounds = array<i64: 4, 512>}]} {
    %c0 = arith.constant 0 : index
    %c0_0 = arith.constant 0 : index
    %0 = vector.load %arg1[%c0, %c0_0] : memref<4x512xf32, #tpu.memory_space<vmem>>, vector<4x512xf32>
    %c0_1 = arith.constant 0 : index
    %c0_2 = arith.constant 0 : index
    %1 = vector.load %arg2[%c0_1, %c0_2] : memref<4x512xf32, #tpu.memory_space<vmem>>, vector<4x512xf32>
    tpu.vector_store %arg2[%c0_1, %c0_2], %0 {strides = array<i32>} : memref<4x512xf32, #tpu.memory_space<vmem>>, vector<4x512xf32>,
    return
  }
  func.func @transform_0(%arg0: i32) -> (i32, i32) {
    %c0_i32 = arith.constant 0 : i32
    %c0_i32_0 = arith.constant 0 : i32
    return %arg0, %c0_i32 : i32, i32
  }
  func.func @transform_1(%arg0: i32) -> (i32, i32) {
    %c0_i32 = arith.constant 0 : i32
    %c0_i32_0 = arith.constant 0 : i32
    return %arg0, %c0_i32 : i32, i32
  }
}

</mosaic_0001>

<bundles_post_ra>
// kernel: pallas_identity.1
= control target key start
LH: loop header
LB: loop body
LE: loop exit
PB: predicated region body
PF: predicated region fallthrough
CT: control target
= control target key end

     0   :  { %s38_s0 = inlined_call_operand.vmem [shape: f32[4,512], index: 0, kind: input, shape index: {}]   ;;  %s39_s1 = inlined_call_operand.vmem [shape: f32[4,512], index: 1, kind: output, shape index: {}]  }
   0x1   :  { %v8_v0 = vld [vmem:[%s38_s0] sm:$0xff]  ;;  %v9_v1 = vld [vmem:[%s38_s0 + $0x8] sm:$0xff] }
   0x2   :  { %10 = vst [vmem:[%s39_s1] sm:$0xff] %v8_v0  ;;  %11 = vst [vmem:[%s39_s1 + $0x8] sm:$0xff] %v9_v1 }

</bundles_post_ra>
